<compile_context>
chip_gen: v7x
topology: tpu7x:2x2x1
jax: 0.10.0
libtpu: 0.0.40
codegen_flags: <defaults>
</compile_context>

<pallas_src>
import functools
import math

import jax
import jax.numpy as jnp
from jax import lax
from jax.experimental import pallas as pl
from jax.experimental.pallas import tpu as pltpu


_VMEM_LIMIT = 32 * 1024 * 1024  # safe on v5e (128 MiB), v6e (128 MiB), v7x (64 MiB)
_MAX_TILE_ROWS = 512            # streaming tile; ~85% of HBM roofline at >=512 rows


def _linear_kernel(x_ref, w_ref, o_ref):
    # x_ref: (TM, K)   streamed token tile
    # w_ref: (Nout, K) PyTorch Linear weight layout, VMEM-resident
    # o_ref: (TM, Nout)
    o_ref[...] = lax.dot_general(
        x_ref[...], w_ref[...],
        dimension_numbers=(((1,), (1,)), ((), ())),   # x @ w.T without a wrapper transpose
        preferred_element_type=jnp.float32,
    ).astype(o_ref.dtype)


def _linear_nobias(x, w):
    """y = x @ w.T   (PyTorch nn.Linear, bias=False).  x: [M, K], w: [Nout, K]."""
    M, K = x.shape
    Nout = w.shape[0]
    TM = M if M <= _MAX_TILE_ROWS else _MAX_TILE_ROWS
    grid = (pl.cdiv(M, TM),)
    return pl.pallas_call(
        _linear_kernel,
        out_shape=jax.ShapeDtypeStruct((M, Nout), x.dtype),
        grid_spec=pltpu.PrefetchScalarGridSpec(
            num_scalar_prefetch=0,
            grid=grid,
            in_specs=[
                pl.BlockSpec((TM, K), lambda i: (i, 0)),     # stream token tiles
                pl.BlockSpec((Nout, K), lambda i: (0, 0)),   # weight stays resident
            ],
            out_specs=pl.BlockSpec((TM, Nout), lambda i: (i, 0)),
        ),
        compiler_params=pltpu.CompilerParams(
            dimension_semantics=("parallel",),
            vmem_limit_bytes=_VMEM_LIMIT,
        ),
    )(x, w)


def _attention_kernel(q_ref, k_ref, v_ref, o_ref, *, scale):
    # q_ref: (TQ, d_k)  query tile of current head
    # k_ref: (N,  d_k)  full keys of current head (resident across query tiles)
    # v_ref: (N,  d_v)  full values of current head
    # o_ref: (TQ, d_v)
    q = q_ref[...].astype(jnp.float32)
    k = k_ref[...].astype(jnp.float32)
    v = v_ref[...].astype(jnp.float32)
    s = lax.dot_general(
        q, k, dimension_numbers=(((1,), (1,)), ((), ())),
        preferred_element_type=jnp.float32) * scale           # (TQ, N)
    m = jnp.max(s, axis=-1, keepdims=True)
    p = jnp.exp(s - m)
    l = jnp.sum(p, axis=-1, keepdims=True)
    ctx = jnp.dot(p, v, preferred_element_type=jnp.float32)    # (TQ, d_v)
    o_ref[...] = (ctx / l).astype(o_ref.dtype)


def _mha_attention(q, k, v, *, scale):
    """Per-head scaled-dot-product attention.  q,k,v: [H, N, d] -> [H, N, d_v]."""
    H, N, d_k = q.shape
    d_v = v.shape[-1]
    TQ = N if N <= _MAX_TILE_ROWS else _MAX_TILE_ROWS
    grid = (H, pl.cdiv(N, TQ))
    kernel = functools.partial(_attention_kernel, scale=scale)
    return pl.pallas_call(
        kernel,
        out_shape=jax.ShapeDtypeStruct((H, N, d_v), q.dtype),
        grid_spec=pltpu.PrefetchScalarGridSpec(
            num_scalar_prefetch=0,
            grid=grid,
            in_specs=[
                pl.BlockSpec((None, TQ, d_k), lambda h, i: (h, i, 0)),  # query tile
                pl.BlockSpec((None, N, d_k), lambda h, i: (h, 0, 0)),   # keys: resident per head
                pl.BlockSpec((None, N, d_v), lambda h, i: (h, 0, 0)),   # values: resident per head
            ],
            out_specs=pl.BlockSpec((None, TQ, d_v), lambda h, i: (h, i, 0)),
        ),
        compiler_params=pltpu.CompilerParams(
            dimension_semantics=("parallel", "parallel"),
            vmem_limit_bytes=_VMEM_LIMIT,
        ),
    )(q, k, v)


def multi_head_attention_forward(x, w_q, w_k, w_v, w_fc, n_heads):
    """Forward pass of MultiHeadAttention.

    x    : [N_tokens, input_dim]
    w_q, w_k : [n_heads*d_k, input_dim]   (PyTorch Linear layout, bias=False)
    w_v  : [n_heads*d_v, input_dim]
    w_fc : [output_dim, n_heads*d_v]
    returns [N_tokens, output_dim]
    """
    M, _ = x.shape
    d_k = w_q.shape[0] // n_heads
    d_v = w_v.shape[0] // n_heads

    # 1) Fused QKV projection (X read from HBM once).
    w_qkv = jnp.concatenate([w_q, w_k, w_v], axis=0)           # [3*H*d_k, input_dim]
    qkv = _linear_nobias(x, w_qkv)                             # [M, 3*H*d_k]

    # Layout plumbing mirroring the reference .view(-1, H, d).transpose(0, 1).
    q = qkv[:, : n_heads * d_k].reshape(M, n_heads, d_k).transpose(1, 0, 2)              # [H, M, d_k]
    k = qkv[:, n_heads * d_k: 2 * n_heads * d_k].reshape(M, n_heads, d_k).transpose(1, 0, 2)
    v = qkv[:, 2 * n_heads * d_k:].reshape(M, n_heads, d_v).transpose(1, 0, 2)

    # 2) Per-head attention.
    context = _mha_attention(q, k, v, scale=1.0 / math.sqrt(d_k))                        # [H, M, d_v]

    # 3) Replicate the reference's context.transpose(1, 2).reshape(-1, H*d_v) exactly.
    context_2d = jnp.transpose(context, (0, 2, 1)).reshape(M, n_heads * d_v)

    # 4) Output projection.
    return _linear_nobias(context_2d, w_fc)                                              # [M, output_dim]


if __name__ == "__main__":
    # Make the pure-JAX reference matmuls run at full f32 precision so the
    # tolerance check against the f32-accumulating Pallas kernels is meaningful.
    jax.config.update("jax_default_matmul_precision", "highest")

    # Small shapes implied by the module: N tokens of dimension input_dim.
    n_tokens = 8
    input_dim = 32
    n_heads = 4
    d_k = d_v = input_dim // n_heads          # 8
    output_dim = input_dim                    # ouput_dim=None branch

    key = jax.random.PRNGKey(0)
    k_x, k_q, k_k, k_v, k_fc = jax.random.split(key, 5)

    x = jax.random.normal(k_x, (n_tokens, input_dim), dtype=jnp.float32)

    bound = 1.0 / math.sqrt(input_dim)
    w_q = jax.random.uniform(k_q, (n_heads * d_k, input_dim), jnp.float32, -bound, bound)
    w_k = jax.random.uniform(k_k, (n_heads * d_k, input_dim), jnp.float32, -bound, bound)
    w_v = jax.random.uniform(k_v, (n_heads * d_v, input_dim), jnp.float32, -bound, bound)
    bound_fc = 1.0 / math.sqrt(n_heads * d_v)
    w_fc = jax.random.uniform(k_fc, (output_dim, n_heads * d_v), jnp.float32, -bound_fc, bound_fc)

    out = multi_head_attention_forward(x, w_q, w_k, w_v, w_fc, n_heads)
    out = jax.block_until_ready(out)

    # Pure-JAX reference mirroring the PyTorch forward op-for-op.
    def ref_forward(x_):
        Q = (x_ @ w_q.T).reshape(-1, n_heads, d_k).transpose(1, 0, 2)
        K = (x_ @ w_k.T).reshape(-1, n_heads, d_k).transpose(1, 0, 2)
        V = (x_ @ w_v.T).reshape(-1, n_heads, d_v).transpose(1, 0, 2)
        scores = jnp.einsum("hqd,hkd->hqk", Q, K) / math.sqrt(d_k)
        attn = jax.nn.softmax(scores, axis=-1)
        context = jnp.einsum("hqk,hkd->hqd", attn, V)
        context = jnp.transpose(context, (0, 2, 1)).reshape(-1, n_heads * d_v)
        return context @ w_fc.T

    ref = ref_forward(x)
    assert out.shape == (n_tokens, output_dim)
    assert jnp.allclose(out, ref, atol=2e-5, rtol=2e-5), float(jnp.max(jnp.abs(out - ref)))

    print("KERNEL_OK")
</pallas_src>

<mosaic_0001>
module attributes {stable_mosaic.version = 11 : i64} {
  func.func @_linear_kernel(%arg0: i32, %arg1: memref<8x32xf32, #tpu.memory_space<vmem>>, %arg2: memref<96x32xf32, #tpu.memory_space<vmem>>, %arg3: memref<8x96xf32, #tpu.memory_space<vmem>>) attributes {dimension_semantics = [#tpu.dimension_semantics<parallel>], iteration_bounds = array<i64: 1>, scalar_prefetch = 0 : i64, scratch_operands = 0 : i64, tpu.core_type = #tpu.core_type<tc>, window_params = [{transform_indices = @transform_0, window_bounds = array<i64: 8, 32>}, {pipeline_mode = #tpu.pipeline_mode<synchronous>, transform_indices = @transform_1, window_bounds = array<i64: 96, 32>}, {transform_indices = @transform_2, window_bounds = array<i64: 8, 96>}]} {
    %c0 = arith.constant 0 : index
    %c0_0 = arith.constant 0 : index
    %0 = vector.load %arg1[%c0, %c0_0] : memref<8x32xf32, #tpu.memory_space<vmem>>, vector<8x32xf32>
    %c0_1 = arith.constant 0 : index
    %c0_2 = arith.constant 0 : index
    %1 = vector.load %arg2[%c0_1, %c0_2] : memref<96x32xf32, #tpu.memory_space<vmem>>, vector<96x32xf32>
    %cst = arith.constant dense<0.000000e+00> : vector<8x96xf32>
    %2 = tpu.matmul %0, %1, %cst {dimension_numbers = #tpu.dot_dimension_numbers<[1], [1], [0], [0], [0, 0, 1, 0], [], []>, precision = #tpu.contract_precision<fp32>} : vector<8x32xf32>, vector<96x32xf32>, vector<8x96xf32> -> vector<8x96xf32>
    %c0_3 = arith.constant 0 : index
    %c0_4 = arith.constant 0 : index
    %3 = vector.load %arg3[%c0_3, %c0_4] : memref<8x96xf32, #tpu.memory_space<vmem>>, vector<8x96xf32>
    tpu.vector_store %arg3[%c0_3, %c0_4], %2 {strides = array<i32>} : memref<8x96xf32, #tpu.memory_space<vmem>>, vector<8x96xf32>,
    return
  }
  func.func @transform_0(%arg0: i32) -> (i32, i32) {
    %c0_i32 = arith.constant 0 : i32
    %c0_i32_0 = arith.constant 0 : i32
    return %arg0, %c0_i32 : i32, i32
  }
  func.func @transform_1(%arg0: i32) -> (i32, i32) {
    %c0_i32 = arith.constant 0 : i32
    %c0_i32_0 = arith.constant 0 : i32
    %c0_i32_1 = arith.constant 0 : i32
    return %c0_i32, %c0_i32_0 : i32, i32
  }
  func.func @transform_2(%arg0: i32) -> (i32, i32) {
    %c0_i32 = arith.constant 0 : i32
    %c0_i32_0 = arith.constant 0 : i32
    return %arg0, %c0_i32 : i32, i32
  }
}

</mosaic_0001>

<bundles_post_ra>
// kernel: tpu_custom_call.1
= control target key start
LH: loop header
LB: loop body
LE: loop exit
PB: predicated region body
PF: predicated region fallthrough
CT: control target
= control target key end

     0   :  { %vm25_vm0 = vcmask 261120   ;;  %v1055_v3 = vmov 0.0|0.0   ;;  %s1341_s0 = inlined_call_operand.vmem [shape: f32[8,32], index: 0, kind: input, shape index: {}]   ;;  %s1342_s1 = inlined_call_operand.vmem [shape: f32[96,32], index: 1, kind: input, shape index: {}]   ;;  %s1343_s2 = inlined_call_operand.hbm [shape: f32[8,96], index: 2, kind: output, shape index: {}]  }
   0x1   :  { %v13_v0 = vld [vmem:[%s1342_s1] sm:$0xff]  ;;  %v14_v1 = vld [vmem:[%s1342_s1 + $0x8] sm:$0xff]  ;;  %v15_v2 = vld [vmem:[%s1342_s1 + $0x10] sm:$0xff]  ;;  %910 = vmatprep.subr.bf16.mxu1 %v1055_v3  ;;  %964 = vmatprep.subr.bf16.mxu0 %v1055_v3 }
   0x2   :  { %v30_v4 = vsel %vm25_vm0, %v13_v0, 0  ;;  %v33_v5 = vsel %vm25_vm0, %v14_v1, 0  ;;  %v16_v6 = vld [vmem:[%s1342_s1 + $0x18] sm:$0xff]  ;;  %v1091_v9 = vsel %vm25_vm0, %v15_v2, 0 }
   0x3   :  { %v66_v7 = vand.u32 4294901760, %v30_v4  ;;  %v69_v8 = vand.u32 4294901760, %v33_v5  ;;  %v1094_v10 = vsel %vm25_vm0, %v16_v6, 0 }
   0x5   :  { %v1096_v11 = vpack.c.bf16 %v69_v8, %v66_v7 }
   0x6   :  { %7 = vsyncpa [#allocation3], 0  ;;  %v72_v12 = vand.u32 4294901760, %v1091_v9  ;;  %v75_v13 = vand.u32 4294901760, %v1094_v10  ;;  %v17_v14 = vld [vmem:[%s1342_s1 + $0x20] sm:$0xff]  ;;  %v18_v15 = vld [vmem:[%s1342_s1 + $0x28] sm:$0xff]  ;;  %v1184_v41 = vsub.f32 %v30_v4, %v66_v7  ;;  %v1186_v42 = vsub.f32 %v33_v5, %v69_v8 }
   0x7   :  { %912 = vmatpush3.bf16.xpose.msra.mxu1 %v1096_v11  ;;  %966 = vmatpush3.bf16.xpose.msra.mxu0 %v1096_v11  ;;  %v1113_v17 = vsel %vm25_vm0, %v17_v14, 0  ;;  %v1116_v18 = vsel %vm25_vm0, %v18_v15, 0  ;;  %vm1056_vm1 = vmmov 0   ;;  %v1057_v19 = vmov 0.0   ;;  %v19_v22 = vld [vmem:[%s1342_s1 + $0x30] sm:$0xff]  ;;  %v20_v23 = vld [vmem:[%s1342_s1 + $0x38] sm:$0xff] }
   0x8   :  { %913 = vmatprep.subr.bf16.mxu1 %v1055_v3  ;;  %967 = vmatprep.subr.bf16.mxu0 %v1055_v3  ;;  %v1110_v16 = vpack.c.bf16 %v75_v13, %v72_v12  ;;  %v78_v20 = vand.u32 4294901760, %v1113_v17  ;;  %v81_v21 = vand.u32 4294901760, %v1116_v18  ;;  %v1137_v25 = vsel %vm25_vm0, %v19_v22, 0  ;;  %v21_v29 = vld [vmem:[%s1342_s1 + $0x40] sm:$0xff]  ;;  %v22_v30 = vld [vmem:[%s1342_s1 + $0x48] sm:$0xff]  ;;  %v23_v38 = vld [vmem:[%s1342_s1 + $0x50] sm:$0xff] }
   0x9   :  { %772 = vmatprep.mubr.msk.f32.mxu1 %vm1056_vm1, %v1057_v19  ;;  %853 = vmatprep.mubr.msk.f32.mxu0 %vm1056_vm1, %v1057_v19  ;;  %v1140_v26 = vsel %vm25_vm0, %v20_v23, 0  ;;  %v84_v27 = vand.u32 4294901760, %v1137_v25  ;;  %v1161_v32 = vsel %vm25_vm0, %v21_v29, 0  ;;  %v1164_v33 = vsel %vm25_vm0, %v22_v30, 0  ;;  %v12_v34 = vld [vmem:[%s1341_s0] sm:$0xff]  ;;  %v24_v39 = vld [vmem:[%s1342_s1 + $0x58] sm:$0xff] }
   0xa   :  { %v1134_v24 = vpack.c.bf16 %v81_v21, %v78_v20  ;;  %v87_v28 = vand.u32 4294901760, %v1140_v26  ;;  %v90_v35 = vand.u32 4294901760, %v1161_v32  ;;  %v93_v36 = vand.u32 4294901760, %v1164_v33  ;;  %s1058_s1 = smov [#allocation2]  }
   0xb   :  { %v27_v37 = vsel %vm25_vm0, %v12_v34, 0  ;;  %v1195_v44 = vsel %vm25_vm0, %v23_v38, 0  ;;  %v1198_v45 = vsel %vm25_vm0, %v24_v39, 0  ;;  %v155_v49 = vand.u32 4294901760, %v1184_v41  ;;  %s662_s6 = sshll.u32 %s1058_s1, 4  ;;  %s663_s6 = int_to_ptr.vmem [resolvable:$true] %s662_s6 }
   0xc   :  { %v1158_v31 = vpack.c.bf16 %v87_v28, %v84_v27  ;;  %v1182_v40 = vand.u32 4294901760, %v27_v37  ;;  %v1192_v43 = vpack.c.bf16 %v93_v36, %v90_v35  ;;  %v96_v47 = vand.u32 4294901760, %v1195_v44  ;;  %s1031_s7 = scalar_lea.vmem %s663_s6, 128  ;;  %p1036_p1 = scmp.lt.s32.totalorder %s663_s6, %s663_s6 }
   0xd   :  { %v99_v48 = vand.u32 4294901760, %v1198_v45  ;;  %v162_v50 = vand.u32 4294901760, %v1186_v42  ;;  %v1212_v51 = vsub.f32 %v1091_v9, %v72_v12  ;;  %v1216_v53 = vsub.f32 %v1094_v10, %v75_v13  ;;  %p1032_p0 = scmp.ne.s32.totalorder %s663_s6, %s1031_s7  ;;  %p1037_p2 = scmp.lt.s32.totalorder %s1031_s7, %s1031_s7 }
   0xe   :  { %v1201_v46 = vsub.f32 %v27_v37, %v1182_v40  ;;  %v156_v55 = vsub.f32 %v1184_v41, %v155_v49  ;;  %v1234_v62 = vsub.f32 %v1113_v17, %v78_v20  ;;  %v1237_v63 = vsub.f32 %v1116_v18, %v81_v21 }
   0xf   :  { %915 = vmatpush3.bf16.xpose.msra.mxu1 %v1110_v16  ;;  %969 = vmatpush3.bf16.xpose.msra.mxu0 %v1110_v16  ;;  %v1222_v54 = vpack.c.bf16 %v99_v48, %v96_v47  ;;  %v163_v56 = vsub.f32 %v1186_v42, %v162_v50  ;;  %v169_v60 = vand.u32 4294901760, %v1212_v51  ;;  %v176_v61 = vand.u32 4294901760, %v1216_v53  ;;  %p1038_p3 = por %p1037_p2, %p1036_p1 }
  0x10   :  { %916 = vmatprep.subr.bf16.mxu1 %v1055_v3  ;;  %970 = vmatprep.subr.bf16.mxu0 %v1055_v3  ;;  %v144_v52 = vand.u32 4294901760, %v1201_v46  ;;  %v157_v58 = vand.u32 4294901760, %v156_v55  ;;  %v983_v2 = vpack.c.bf16 %v162_v50, %v155_v49  ;;  %v183_v8 = vand.u32 4294901760, %v1234_v62 }
  0x11   :  { %v164_v59 = vand.u32 4294901760, %v163_v56  ;;  %v170_v4 = vsub.f32 %v1212_v51, %v169_v60  ;;  %v177_v5 = vsub.f32 %v1216_v53, %v176_v61  ;;  %v190_v9 = vand.u32 4294901760, %v1237_v63  ;;  %p1039_p4 = pnand %p1038_p3, %p1032_p0 }
  0x12   :  { %v145_v57 = vsub.f32 %v1201_v46, %v144_v52  ;;  %v1252_v10 = vsub.f32 %v1137_v25, %v84_v27  ;;  %v1257_v12 = vsub.f32 %v1140_v26, %v87_v28  ;;  %v986_v14 = vpack.c.bf16 %v176_v61, %v169_v60 }
  0x13   :  { %v929_v1 = vpack.c.bf16 %v164_v59, %v157_v58  ;;  %v171_v6 = vand.u32 4294901760, %v170_v4  ;;  %v178_v7 = vand.u32 4294901760, %v177_v5  ;;  %v184_v15 = vsub.f32 %v1234_v62, %v183_v8 }
  0x14   :  { %v146_v0 = vand.u32 4294901760, %v145_v57  ;;  %v191_v17 = vsub.f32 %v1237_v63, %v190_v9  ;;  %v197_v21 = vand.u32 4294901760, %v1252_v10  ;;  %v204_v22 = vand.u32 4294901760, %v1257_v12 }
  0x15   :  { %v932_v13 = vpack.c.bf16 %v178_v7, %v171_v6  ;;  %v185_v18 = vand.u32 4294901760, %v184_v15  ;;  %v1268_v23 = vsub.f32 %v1161_v32, %v90_v35  ;;  %v1273_v25 = vsub.f32 %v1164_v33, %v93_v36 }
  0x16   :  { %v192_v20 = vand.u32 4294901760, %v191_v17  ;;  %v989_v27 = vpack.c.bf16 %v190_v9, %v183_v8  ;;  %v198_v28 = vsub.f32 %v1252_v10, %v197_v21  ;;  %v205_v29 = vsub.f32 %v1257_v12, %v204_v22 }
  0x17   :  { %918 = vmatpush3.bf16.xpose.msra.mxu1 %v1134_v24  ;;  %972 = vmatpush3.bf16.xpose.msra.mxu0 %v1134_v24  ;;  %v211_v37 = vand.u32 4294901760, %v1268_v23  ;;  %v218_v32 = vand.u32 4294901760, %v1273_v25  ;;  %v224_v33 = vsub.f32 %v1195_v44, %v96_v47  ;;  %v231_v35 = vsub.f32 %v1198_v45, %v99_v48 }
  0x18   :  { %919 = vmatprep.subr.bf16.mxu1 %v1055_v3  ;;  %973 = vmatprep.subr.bf16.mxu0 %v1055_v3  ;;  %v935_v26 = vpack.c.bf16 %v192_v20, %v185_v18  ;;  %v199_v30 = vand.u32 4294901760, %v198_v28  ;;  %v206_v34 = vand.u32 4294901760, %v205_v29  ;;  %v992_v38 = vpack.c.bf16 %v204_v22, %v197_v21 }
  0x19   :  { %v212_v39 = vsub.f32 %v1268_v23, %v211_v37  ;;  %v219_v49 = vsub.f32 %v1273_v25, %v218_v32  ;;  %v225_v55 = vand.u32 4294901760, %v224_v33  ;;  %v232_v56 = vand.u32 4294901760, %v231_v35 }
  0x1a   :  { %v938_v36 = vpack.c.bf16 %v206_v34, %v199_v30  ;;  %v995_v47 = vpack.c.bf16 %v218_v32, %v211_v37  ;;  %v947_v61 = vpack.c.bf16 %v1186_v42, %v1184_v41  ;;  %v950_v41 = vpack.c.bf16 %v1216_v53, %v1212_v51 }
  0x1b   :  { %v213_v50 = vand.u32 4294901760, %v212_v39  ;;  %v226_v57 = vsub.f32 %v224_v33, %v225_v55  ;;  %v233_v45 = vsub.f32 %v231_v35, %v232_v56  ;;  %v998_v60 = vpack.c.bf16 %v232_v56, %v225_v55 }
  0x1c   :  { %vm654_vm2 = vcmask 785408  }
  0x1d   :  { %v227_v48 = vand.u32 4294901760, %v226_v57  ;;  %v234_v58 = vand.u32 4294901760, %v233_v45 }
  0x1f   :  { %921 = vmatpush3.bf16.xpose.msra.mxu1 %v1158_v31  ;;  %975 = vmatpush3.bf16.xpose.msra.mxu0 %v1158_v31  ;;  %v944_v59 = vpack.c.bf16 %v234_v58, %v227_v48 }
  0x20   :  { %922 = vmatprep.subr.bf16.mxu1 %v1055_v3  ;;  %976 = vmatprep.subr.bf16.mxu0 %v1055_v3 }
  0x27   :  { %924 = vmatpush3.bf16.xpose.msra.mxu1 %v1192_v43  ;;  %978 = vmatpush3.bf16.xpose.msra.mxu0 %v1192_v43 }
  0x28   :  { %925 = vmatprep.subr.bf16.mxu1 %v1055_v3  ;;  %979 = vmatprep.subr.bf16.mxu0 %v1055_v3 }
  0x2f   :  { %927 = vmatpush3.bf16.xpose.msra.mxu1 %v1222_v54  ;;  %981 = vmatpush3.bf16.xpose.msra.mxu0 %v1222_v54 }
  0x30   :  { %928 = vmatprep.subr.bf16.mxu1 %v1055_v3  ;;  %982 = vmatprep.subr.bf16.mxu0 %v1055_v3 }
  0x36   :  { %773 = vmatmul.mubr.f32.vlgmr.msra.gmra.mrb[0].mxu1 %v146_v0  ;;  %854 = vmatmul.mubr.f32.vlgmr.msra.gmra.mrb[0].mxu0 %v144_v52  ;;  %v220_v52 = vand.u32 4294901760, %v219_v49 }
  0x37   :  { %930 = vmatpush3.bf16.xpose.msra.mxu1 %v929_v1  ;;  %984 = vmatpush3.bf16.xpose.msra.mxu0 %v983_v2 }
  0x38   :  { %931 = vmatprep.subr.bf16.mxu1 %v1055_v3  ;;  %985 = vmatprep.subr.bf16.mxu0 %v1055_v3  ;;  %v941_v44 = vpack.c.bf16 %v220_v52, %v213_v50 }
  0x39   :  { %799 = vmatprep.mubr.msk.f32.mxu1 %vm1056_vm1, %v1057_v19  ;;  %880 = vmatprep.mubr.msk.f32.mxu0 %vm1056_vm1, %v1057_v19 }
  0x3f   :  { %933 = vmatpush3.bf16.xpose.msra.mxu1 %v932_v13  ;;  %987 = vmatpush3.bf16.xpose.msra.mxu0 %v986_v14 }
  0x40   :  { %934 = vmatprep.subr.bf16.mxu1 %v1055_v3  ;;  %988 = vmatprep.subr.bf16.mxu0 %v1055_v3 }
  0x47   :  { %936 = vmatpush3.bf16.xpose.msra.mxu1 %v935_v26  ;;  %990 = vmatpush3.bf16.xpose.msra.mxu0 %v989_v27 }
  0x48   :  { %937 = vmatprep.subr.bf16.mxu1 %v1055_v3  ;;  %991 = vmatprep.subr.bf16.mxu0 %v1055_v3 }
  0x4f   :  { %939 = vmatpush3.bf16.xpose.msra.mxu1 %v938_v36  ;;  %993 = vmatpush3.bf16.xpose.msra.mxu0 %v992_v38 }
  0x50   :  { %940 = vmatprep.subr.bf16.mxu1 %v1055_v3  ;;  %994 = vmatprep.subr.bf16.mxu0 %v1055_v3 }
  0x57   :  { %942 = vmatpush3.bf16.xpose.msra.mxu1 %v941_v44  ;;  %996 = vmatpush3.bf16.xpose.msra.mxu0 %v995_v47 }
  0x58   :  { %943 = vmatprep.subr.bf16.mxu1 %v1055_v3  ;;  %997 = vmatprep.subr.bf16.mxu0 %v1055_v3 }
  0x5f   :  { %945 = vmatpush3.bf16.xpose.msra.mxu1 %v944_v59  ;;  %999 = vmatpush3.bf16.xpose.msra.mxu0 %v998_v60 }
  0x60   :  { %946 = vmatprep.subr.bf16.mxu1 %v1055_v3  ;;  %1000 = vmatprep.subr.bf16.mxu0 %v1055_v3 }
  0x66   :  { %800 = vmatmul.mubr.f32.vlgmr.msra.gmra.mrb[0].mxu1 %v1182_v40  ;;  %881 = vmatmul.mubr.f32.vlgmr.msra.gmra.mrb[0].mxu0 %v1182_v40 }
  0x67   :  { %948 = vmatpush3.bf16.xpose.msra.mxu1 %v947_v61  ;;  %1002 = vmatpush3.bf16.xpose.msra.mxu0 %v1096_v11  ;;  %v953_v11 = vpack.c.bf16 %v1237_v63, %v1234_v62 }
  0x68   :  { %949 = vmatprep.subr.bf16.mxu1 %v1055_v3  ;;  %1003 = vmatprep.subr.bf16.mxu0 %v1055_v3 }
  0x69   :  { %826 = vmatprep.mubr.msk.f32.mxu1 %vm1056_vm1, %v1057_v19  ;;  %907 = vmatprep.mubr.msk.f32.mxu0 %vm1056_vm1, %v1057_v19  ;;  %v956_v19 = vpack.c.bf16 %v1257_v12, %v1252_v10 }
  0x6f   :  { %951 = vmatpush3.bf16.xpose.msra.mxu1 %v950_v41  ;;  %1005 = vmatpush3.bf16.xpose.msra.mxu0 %v1110_v16  ;;  %v959_v16 = vpack.c.bf16 %v1273_v25, %v1268_v23 }
  0x70   :  { %952 = vmatprep.subr.bf16.mxu1 %v1055_v3  ;;  %1006 = vmatprep.subr.bf16.mxu0 %v1055_v3 }
  0x77   :  { %954 = vmatpush3.bf16.xpose.msra.mxu1 %v953_v11  ;;  %1008 = vmatpush3.bf16.xpose.msra.mxu0 %v1134_v24  ;;  %v962_v24 = vpack.c.bf16 %v231_v35, %v224_v33 }
  0x78   :  { %955 = vmatprep.subr.bf16.mxu1 %v1055_v3  ;;  %1009 = vmatprep.subr.bf16.mxu0 %v1055_v3 }
  0x7f   :  { %957 = vmatpush3.bf16.xpose.msra.mxu1 %v956_v19  ;;  %1011 = vmatpush3.bf16.xpose.msra.mxu0 %v1158_v31 }
  0x80   :  { %958 = vmatprep.subr.bf16.mxu1 %v1055_v3  ;;  %1012 = vmatprep.subr.bf16.mxu0 %v1055_v3 }
  0x87   :  { %960 = vmatpush3.bf16.xpose.msra.mxu1 %v959_v16  ;;  %1014 = vmatpush3.bf16.xpose.msra.mxu0 %v1192_v43 }
  0x88   :  { %961 = vmatprep.subr.bf16.mxu1 %v1055_v3  ;;  %1015 = vmatprep.subr.bf16.mxu0 %v1055_v3 }
  0x8f   :  { %963 = vmatpush3.bf16.xpose.msra.mxu1 %v962_v24  ;;  %1017 = vmatpush3.bf16.xpose.msra.mxu0 %v1222_v54 }
  0x96   :  { %827 = vmatmul.mubr.f32.vlgmr.msra.gmra.mrb[0].mxu1 %v1201_v46  ;;  %908 = vmatmul.mubr.f32.vlgmr.msra.gmra.mrb[0].mxu0 %v1182_v40 }
 0x169   :  { %v375_v31 = vpop.f32.mrb[0].mxu1  ;;  %v650_v42 = vpop.f32.mrb[0].mxu0 }
 0x16a   :  { %v1018_v51 = vadd.f32 %v650_v42, %v375_v31  ;;  %v828_v53 = vpop.f32.mrb[1].mxu1  ;;  %v909_v43 = vpop.f32.mrb[1].mxu0 }
 0x16c   :  { %655 = vst.msk [vmem:[#allocation2] sm:$0xff] %vm654_vm2, %v1018_v51 }
 0x16d   :  { %1042 = shalt.err (!%p1039_p4)
}
 0x16e   :  { %s1043_s10 = scalar_lea.hbm %s1343_s2, 128 }
 0x16f   :  { %p1044_p5 = scmp.ne.s32.totalorder %s1343_s2, %s1043_s10  ;;  %p1047_p6 = scmp.lt.u32.totalorder %s1043_s10, %s1343_s2 }
 0x171   :  { %p1049_p7 = pnand %p1047_p6, %p1044_p5 }
 0x173   :  { %1052 = shalt.err (!%p1049_p7)
}
 0x174   :  { %665 = dma.vmem_to_hbm [thread:$0]  %s663_s6, 128, %s1343_s2, [#allocation3]  }
 0x175   :  { %1053 = dma.done.wait [#allocation3], 128  }
 0x176   :  { %1054 = vsyncadd [#allocation3], 4294967168 }
 0x177   :  { %669 = vsyncpa [#allocation3], 1 }

</bundles_post_ra>
